<compile_context>
chip_gen: v6e
topology: v6e:2x2x1
jax: 0.10.0
libtpu: 0.0.40
codegen_flags: <defaults>
</compile_context>

<pallas_src>
import jax
import jax.numpy as jnp
from jax.experimental import pallas as pl
from jax.experimental.pallas import tpu as pltpu


def _meanstd_kernel(mean_ref, inv_std_ref, x_ref, o_ref):
    # mean_ref / inv_std_ref: (br, 1) float32 VMEM  (per-row params, lane-broadcast)
    # x_ref / o_ref:          (br, bc) VMEM tile of the flattened (N*C, H*W) array
    x = x_ref[...].astype(jnp.float32)
    o_ref[...] = ((x - mean_ref[...]) * inv_std_ref[...]).astype(o_ref.dtype)


def _block_dim(extent, align, max_block):
    """Full extent if small; otherwise the largest align-multiple <= max_block.

    Partial edge blocks are fine (Pallas pads reads / masks writes); the block
    itself only needs to be align-divisible or equal to the full array dim.
    """
    if extent <= max_block:
        return extent
    return max(align, (max_block // align) * align)


def mean_std_transform(x, mean, std):
    """Equivalent of MeanStdTransformer(mean, std)(x) for NCHW input."""
    N, C, H, W = x.shape
    R, L = N * C, H * W

    # Keep params in float32 regardless of x.dtype (v5e has no bf16 VPU/EUP path,
    # and this avoids low-precision reciprocal error). Precompute 1/std once.
    mean_c = jnp.asarray(mean, dtype=jnp.float32).reshape(C)
    inv_std_c = 1.0 / jnp.asarray(std, dtype=jnp.float32).reshape(C)

    # Row r of the flattened array corresponds to channel r % C -> tile over N.
    mean_r = jnp.tile(mean_c, (N,)).reshape(R, 1)
    inv_std_r = jnp.tile(inv_std_c, (N,)).reshape(R, 1)

    x2 = x.reshape(R, L)

    # ~2 MiB f32 max per block (512 x 1024); with in/out double-buffered this is
    # ~8 MiB of VMEM -> comfortably within scoped limits on v5e/v6e/v7x while
    # already past the ~85% HBM-roofline knee for elementwise kernels.
    br = _block_dim(R, 8, 512)
    bc = _block_dim(L, 128, 1024)
    grid = (pl.cdiv(R, br), pl.cdiv(L, bc))

    out2 = pl.pallas_call(
        _meanstd_kernel,
        out_shape=jax.ShapeDtypeStruct((R, L), x.dtype),
        grid=grid,
        in_specs=[
            pl.BlockSpec((br, 1), lambda i, j: (i, 0)),   # mean rows
            pl.BlockSpec((br, 1), lambda i, j: (i, 0)),   # inv_std rows
            pl.BlockSpec((br, bc), lambda i, j: (i, j)),  # x tile
        ],
        out_specs=pl.BlockSpec((br, bc), lambda i, j: (i, j)),
        compiler_params=pltpu.CompilerParams(
            dimension_semantics=("parallel", "parallel"),
            vmem_limit_bytes=32 << 20,
        ),
    )(mean_r, inv_std_r, x2)

    return out2.reshape(N, C, H, W)


if __name__ == "__main__":
    key = jax.random.PRNGKey(0)
    # Small NCHW input consistent with the module: batch=2, channels=4, 16x16.
    x = jax.random.uniform(key, (2, 4, 16, 16), dtype=jnp.float32)

    # Deterministic per-channel mean/std (ImageNet-style values + one extra ch).
    mean = [0.485, 0.456, 0.406, 0.5]
    std = [0.229, 0.224, 0.225, 0.25]

    y = mean_std_transform(x, mean, std)
    jax.block_until_ready(y)

    # Reference check against plain-JAX broadcast semantics (same as PyTorch).
    # Note: kernel uses multiply-by-reciprocal, so allow a couple of ulps vs
    # true division.
    mean_b = jnp.asarray(mean, jnp.float32).reshape(1, 4, 1, 1)
    std_b = jnp.asarray(std, jnp.float32).reshape(1, 4, 1, 1)
    ref = (x - mean_b) / std_b
    assert y.shape == ref.shape and y.dtype == ref.dtype
    assert jnp.allclose(y, ref, atol=1e-6, rtol=1e-5)

    print("KERNEL_OK")
</pallas_src>

<mosaic_0001>
module attributes {stable_mosaic.version = 11 : i64} {
  func.func @_meanstd_kernel(%arg0: i32, %arg1: i32, %arg2: memref<8x1xf32, #tpu.memory_space<vmem>>, %arg3: memref<8x1xf32, #tpu.memory_space<vmem>>, %arg4: memref<8x256xf32, #tpu.memory_space<vmem>>, %arg5: memref<8x256xf32, #tpu.memory_space<vmem>>) attributes {dimension_semantics = [#tpu.dimension_semantics<parallel>, #tpu.dimension_semantics<parallel>], iteration_bounds = array<i64: 1, 1>, scalar_prefetch = 0 : i64, scratch_operands = 0 : i64, tpu.core_type = #tpu.core_type<tc>, window_params = [{transform_indices = @transform_0, window_bounds = array<i64: 8, 1>}, {transform_indices = @transform_1, window_bounds = array<i64: 8, 1>}, {transform_indices = @transform_2, window_bounds = array<i64: 8, 256>}, {transform_indices = @transform_3, window_bounds = array<i64: 8, 256>}]} {
    %c0 = arith.constant 0 : index
    %c0_0 = arith.constant 0 : index
    %0 = vector.load %arg4[%c0, %c0_0] : memref<8x256xf32, #tpu.memory_space<vmem>>, vector<8x256xf32>
    %c0_1 = arith.constant 0 : index
    %c0_2 = arith.constant 0 : index
    %1 = vector.load %arg2[%c0_1, %c0_2] : memref<8x1xf32, #tpu.memory_space<vmem>>, vector<8x1xf32>
    %2 = vector.broadcast %1 : vector<8x1xf32> to vector<8x256xf32>
    %3 = arith.subf %0, %2 : vector<8x256xf32>
    %c0_3 = arith.constant 0 : index
    %c0_4 = arith.constant 0 : index
    %4 = vector.load %arg3[%c0_3, %c0_4] : memref<8x1xf32, #tpu.memory_space<vmem>>, vector<8x1xf32>
    %5 = vector.broadcast %4 : vector<8x1xf32> to vector<8x256xf32>
    %6 = arith.mulf %3, %5 : vector<8x256xf32>
    %c0_5 = arith.constant 0 : index
    %c0_6 = arith.constant 0 : index
    %7 = vector.load %arg5[%c0_5, %c0_6] : memref<8x256xf32, #tpu.memory_space<vmem>>, vector<8x256xf32>
    tpu.vector_store %arg5[%c0_5, %c0_6], %6 {strides = array<i32>} : memref<8x256xf32, #tpu.memory_space<vmem>>, vector<8x256xf32>,
    return
  }
  func.func @transform_0(%arg0: i32, %arg1: i32) -> (i32, i32) {
    %c0_i32 = arith.constant 0 : i32
    %c0_i32_0 = arith.constant 0 : i32
    return %arg0, %c0_i32 : i32, i32
  }
  func.func @transform_1(%arg0: i32, %arg1: i32) -> (i32, i32) {
    %c0_i32 = arith.constant 0 : i32
    %c0_i32_0 = arith.constant 0 : i32
    return %arg0, %c0_i32 : i32, i32
  }
  func.func @transform_2(%arg0: i32, %arg1: i32) -> (i32, i32) {
    %c0_i32 = arith.constant 0 : i32
    return %arg0, %arg1 : i32, i32
  }
  func.func @transform_3(%arg0: i32, %arg1: i32) -> (i32, i32) {
    %c0_i32 = arith.constant 0 : i32
    return %arg0, %arg1 : i32, i32
  }
}

</mosaic_0001>

<bundles_post_ra>
// kernel: tpu_custom_call.1
= control target key start
LH: loop header
LB: loop body
LE: loop exit
PB: predicated region body
PF: predicated region fallthrough
CT: control target
= control target key end

     0   :  { %v74_v1 = vmov 0   ;;  %s111_s0 = inlined_call_operand.vmem [shape: f32[8,1], index: 0, kind: input, shape index: {}]   ;;  %s112_s1 = inlined_call_operand.vmem [shape: f32[8,1], index: 1, kind: input, shape index: {}]   ;;  %s113_s2 = inlined_call_operand.vmem [shape: f32[8,256], index: 2, kind: input, shape index: {}]   ;;  %s114_s3 = inlined_call_operand.hbm [shape: f32[8,256], index: 3, kind: output, shape index: {}]  }
   0x1   :  { %v17_v0 = vld [vmem:[%s111_s0] sm:$0xff]  ;;  %51 = vset.pattern.permute.xlu0 %v74_v1 }
   0x2   :  { %8 = vsyncpa [#allocation3], 0  ;;  %20 = vperm.xlu0 %51, %v17_v0   ;;  %v25_v2 = vld [vmem:[%s112_s1] sm:$0xff]  ;;  %v16_v5 = vld [vmem:[%s113_s2 + $0x8] sm:$0xff]  ;;  %s75_s20 = smov [#allocation2]  }
   0x3   :  { %v15_v4 = vld [vmem:[%s113_s2] sm:$0xff]  ;;  %s41_s0 = sshll.u32 %s75_s20, 4  ;;  %s42_s0 = int_to_ptr.vmem [resolvable:$true] %s41_s0 }
   0x4   :  { %s52_s1 = scalar_lea.vmem %s42_s0, 256  ;;  %p57_p1 = scmp.lt.s32.totalorder %s42_s0, %s42_s0 }
   0x5   :  { %p53_p0 = scmp.ne.s32.totalorder %s42_s0, %s52_s1  ;;  %p58_p2 = scmp.lt.s32.totalorder %s52_s1, %s52_s1 }
   0x6   :  { %28 = vperm.xlu0 %51, %v25_v2  }
   0x7   :  { %p59_p3 = por %p58_p2, %p57_p1 }
   0x9   :  { %p60_p4 = pnand %p59_p3, %p53_p0 }
  0x7d   :  { %v21_v3 = vpop.permute.xlu0 %20 }
  0x7e   :  { %v23_v6 = vsub.f32 %v15_v4, %v21_v3  ;;  %v24_v7 = vsub.f32 %v16_v5, %v21_v3 }
  0x81   :  { %v29_v8 = vpop.permute.xlu0 %28 }
  0x82   :  { %v31_v9 = vmul.f32 %v29_v8, %v23_v6  ;;  %v32_v10 = vmul.f32 %v29_v8, %v24_v7 }
  0x84   :  { %33 = vst [vmem:[#allocation2] sm:$0xff] %v31_v9  ;;  %34 = vst [vmem:[#allocation2 + $0x8] sm:$0xff] %v32_v10 }
  0x85   :  { %63 = shalt.err (!%p60_p4)
}
  0x86   :  { %44 = dma.vmem_to_hbm [thread:$0]  %s42_s0, 256, %s114_s3, [#allocation3]  }
  0x87   :  { %72 = dma.done.wait [#allocation3], 256  }
  0x88   :  { %73 = vsyncadd [#allocation3], 4294967040 }
  0x89   :  { %48 = vsyncpa [#allocation3], 1 }

</bundles_post_ra>
